<compile_context>
chip_gen: v5e
topology: v5e:2x2
jax: 0.10.0
libtpu: 0.0.40
codegen_flags: <defaults>
</compile_context>

<pallas_src>
import jax
import jax.numpy as jnp
from jax.experimental import pallas as pl
from jax.experimental.pallas import tpu as pltpu

_LANE = 128                      # pad tiny hidden (16) and out (1) dims to full lanes
_VMEM_LIMIT = 32 * 1024 * 1024   # safe scoped-VMEM limit on v5e/v6e/v7x


def _round_up(x: int, m: int) -> int:
    return (x + m - 1) // m * m


def _pick_tiles(n: int):
    """Padded node count + row-tile size.

    Keeps two bf16 A-row buffers (double buffering) well under the scoped VMEM
    limit on every generation.
    """
    n_pad = _round_up(max(n, 8), _LANE)
    tm = 256
    if n_pad % tm != 0 or 2 * tm * n_pad * 2 > 12 * 1024 * 1024:
        tm = 128
    return n_pad, min(tm, n_pad)


def build_norm_adj(edge_index: jnp.ndarray, num_nodes: int) -> jnp.ndarray:
    """Dense D^{-1/2}(A + I)D^{-1/2}, matching PyG GCNConv's gcn_norm (f32)."""
    src = edge_index[0]
    dst = edge_index[1]
    a = jnp.zeros((num_nodes, num_nodes), jnp.float32)
    a = a.at[dst, src].max(1.0)                                   # edge j -> i
    a = jnp.maximum(a, jnp.eye(num_nodes, dtype=jnp.float32))     # self loops
    deg = a.sum(axis=1)
    dinv = jax.lax.rsqrt(deg)
    return dinv[:, None] * a * dinv[None, :]


def _layer1_train_kernel(a_ref, xw1_ref, b1_ref, w2_ref, mask_ref, hw2_ref):
    """Pass 1 (train): HW2_tile = (relu(A_tile @ XW1 + b1) * mask) @ W2."""
    h = jnp.dot(a_ref[...], xw1_ref[...], preferred_element_type=jnp.float32)
    h = jnp.maximum(h + b1_ref[...], 0.0)                         # bias + ReLU
    h = h * mask_ref[...]                                         # inverted dropout
    hw2_ref[...] = jnp.dot(h.astype(jnp.bfloat16), w2_ref[...],
                           preferred_element_type=jnp.float32).astype(hw2_ref.dtype)


def _layer1_eval_kernel(a_ref, xw1_ref, b1_ref, w2_ref, hw2_ref):
    """Pass 1 (eval): HW2_tile = relu(A_tile @ XW1 + b1) @ W2."""
    h = jnp.dot(a_ref[...], xw1_ref[...], preferred_element_type=jnp.float32)
    h = jnp.maximum(h + b1_ref[...], 0.0)
    hw2_ref[...] = jnp.dot(h.astype(jnp.bfloat16), w2_ref[...],
                           preferred_element_type=jnp.float32).astype(hw2_ref.dtype)


def _layer2_kernel(a_ref, hw2_ref, b2_ref, o_ref):
    """Pass 2: Y_tile = A_tile @ HW2 + b2."""
    y = jnp.dot(a_ref[...], hw2_ref[...], preferred_element_type=jnp.float32)
    o_ref[...] = y + b2_ref[...]


def gcn_forward(x, edge_index, params, *, drop_rate=0.5, training=False, seed=0):
    """GCN forward: GCNConv(F->16) -> ReLU -> dropout -> GCNConv(16->1)."""
    w1, b1, w2, b2 = params
    n = x.shape[0]
    hidden = w1.shape[1]
    out_dim = w2.shape[1]
    assert hidden <= _LANE and out_dim <= _LANE

    n_pad, tm = _pick_tiles(n)
    n_tiles = n_pad // tm

    # ---- JAX glue (tiny, not the hot path) -------------------------------
    a_hat = build_norm_adj(edge_index, n)
    a_bf = jnp.zeros((n_pad, n_pad), jnp.bfloat16).at[:n, :n].set(
        a_hat.astype(jnp.bfloat16))

    xw1 = jnp.dot(x, w1)                                    # [n, hidden], hoisted
    xw1_p = jnp.zeros((n_pad, _LANE), jnp.bfloat16).at[:n, :hidden].set(
        xw1.astype(jnp.bfloat16))
    b1_p = jnp.zeros((1, _LANE), jnp.float32).at[:, :hidden].set(b1)
    w2_p = jnp.zeros((_LANE, _LANE), jnp.bfloat16).at[:hidden, :out_dim].set(
        w2.astype(jnp.bfloat16))
    b2_p = jnp.zeros((1, _LANE), jnp.float32).at[:, :out_dim].set(b2)

    apply_dropout = bool(training) and float(drop_rate) > 0.0
    if apply_dropout:
        keep_p = 1.0 - float(drop_rate)
        keep = jax.random.bernoulli(jax.random.PRNGKey(seed), p=keep_p,
                                    shape=(n_pad, _LANE))
        mask = keep.astype(jnp.float32) * jnp.float32(1.0 / keep_p)  # pre-scaled

    cparams = pltpu.CompilerParams(
        dimension_semantics=("parallel",),
        vmem_limit_bytes=_VMEM_LIMIT,
    )

    # ---- pass 1: stream A rows, produce HW2 = dropout(relu(A XW1 + b1)) W2 ----
    l1_in_specs = [
        pl.BlockSpec((tm, n_pad), lambda i: (i, 0)),        # A row tile (streamed)
        pl.BlockSpec((n_pad, _LANE), lambda i: (0, 0)),     # X@W1 (resident)
        pl.BlockSpec((1, _LANE), lambda i: (0, 0)),         # b1
        pl.BlockSpec((_LANE, _LANE), lambda i: (0, 0)),     # W2 (padded)
    ]
    l1_args = [a_bf, xw1_p, b1_p, w2_p]
    if apply_dropout:
        l1_in_specs.append(pl.BlockSpec((tm, _LANE), lambda i: (i, 0)))  # mask tile
        l1_args.append(mask)
        layer1 = _layer1_train_kernel
    else:
        layer1 = _layer1_eval_kernel

    hw2 = pl.pallas_call(
        layer1,
        out_shape=jax.ShapeDtypeStruct((n_pad, _LANE), jnp.bfloat16),
        grid=(n_tiles,),
        in_specs=l1_in_specs,
        out_specs=pl.BlockSpec((tm, _LANE), lambda i: (i, 0)),
        compiler_params=cparams,
    )(*l1_args)

    # ---- pass 2: stream A rows again, aggregate HW2, add b2 --------------
    y_pad = pl.pallas_call(
        _layer2_kernel,
        out_shape=jax.ShapeDtypeStruct((n_pad, _LANE), jnp.float32),
        grid=(n_tiles,),
        in_specs=[
            pl.BlockSpec((tm, n_pad), lambda i: (i, 0)),    # A row tile (streamed)
            pl.BlockSpec((n_pad, _LANE), lambda i: (0, 0)), # HW2 (resident)
            pl.BlockSpec((1, _LANE), lambda i: (0, 0)),     # b2
        ],
        out_specs=pl.BlockSpec((tm, _LANE), lambda i: (i, 0)),
        compiler_params=cparams,
    )(a_bf, hw2, b2_p)

    return y_pad[:n, :out_dim]


def _reference_forward(x, edge_index, params):
    """Pure-JAX reference (eval mode) mirroring the kernel's bf16 storage."""
    w1, b1, w2, b2 = params
    f32 = jnp.float32
    a = build_norm_adj(edge_index, x.shape[0]).astype(jnp.bfloat16).astype(f32)
    xw1 = jnp.dot(x, w1).astype(jnp.bfloat16).astype(f32)
    h = jnp.maximum(a @ xw1 + b1, 0.0)
    hw2 = (h.astype(jnp.bfloat16).astype(f32)
           @ w2.astype(jnp.bfloat16).astype(f32)).astype(jnp.bfloat16).astype(f32)
    return a @ hw2 + b2


if __name__ == "__main__":
    # Small, deterministic problem: N=32 nodes, F=8 features, E=64 edges.
    N, F, H, O, E = 32, 8, 16, 1, 64
    key = jax.random.PRNGKey(0)
    k_x, k_e1, k_e2, k_w1, k_b1, k_w2, k_b2 = jax.random.split(key, 7)

    x = jax.random.normal(k_x, (N, F), dtype=jnp.float32)
    edge_index = jnp.stack(
        [jax.random.randint(k_e1, (E,), 0, N),
         jax.random.randint(k_e2, (E,), 0, N)], axis=0).astype(jnp.int32)

    w1 = jax.random.normal(k_w1, (F, H), dtype=jnp.float32) * (1.0 / jnp.sqrt(F))
    b1 = jax.random.normal(k_b1, (1, H), dtype=jnp.float32) * 0.1
    w2 = jax.random.normal(k_w2, (H, O), dtype=jnp.float32) * (1.0 / jnp.sqrt(H))
    b2 = jax.random.normal(k_b2, (1, O), dtype=jnp.float32) * 0.1
    params = (w1, b1, w2, b2)

    # Eval-mode forward (dropout identity) vs bf16-consistent JAX reference.
    out = gcn_forward(x, edge_index, params, drop_rate=0.5, training=False)
    out = jax.block_until_ready(out)
    ref = _reference_forward(x, edge_index, params)
    assert out.shape == (N, O)
    assert jnp.allclose(out, ref, atol=1e-2, rtol=1e-2), "mismatch vs JAX reference"

    # Train-mode smoke test: exercises the streamed inverted-dropout mask path.
    out_train = gcn_forward(x, edge_index, params,
                            drop_rate=0.5, training=True, seed=123)
    out_train = jax.block_until_ready(out_train)
    assert out_train.shape == (N, O)
    assert bool(jnp.isfinite(out_train).all())

    print("KERNEL_OK")
</pallas_src>

<mosaic_0001>
module attributes {stable_mosaic.version = 11 : i64} {
  func.func @_layer1_eval_kernel(%arg0: i32, %arg1: memref<128x128xbf16, #tpu.memory_space<vmem>>, %arg2: memref<128x128xbf16, #tpu.memory_space<vmem>>, %arg3: memref<1x128xf32, #tpu.memory_space<vmem>>, %arg4: memref<128x128xbf16, #tpu.memory_space<vmem>>, %arg5: memref<128x128xbf16, #tpu.memory_space<vmem>>) attributes {dimension_semantics = [#tpu.dimension_semantics<parallel>], iteration_bounds = array<i64: 1>, scalar_prefetch = 0 : i64, scratch_operands = 0 : i64, tpu.core_type = #tpu.core_type<tc>, window_params = [{transform_indices = @transform_0, window_bounds = array<i64: 128, 128>}, {pipeline_mode = #tpu.pipeline_mode<synchronous>, transform_indices = @transform_1, window_bounds = array<i64: 128, 128>}, {pipeline_mode = #tpu.pipeline_mode<synchronous>, transform_indices = @transform_2, window_bounds = array<i64: 1, 128>}, {pipeline_mode = #tpu.pipeline_mode<synchronous>, transform_indices = @transform_3, window_bounds = array<i64: 128, 128>}, {transform_indices = @transform_4, window_bounds = array<i64: 128, 128>}]} {
    %c0 = arith.constant 0 : index
    %c0_0 = arith.constant 0 : index
    %0 = vector.load %arg1[%c0, %c0_0] : memref<128x128xbf16, #tpu.memory_space<vmem>>, vector<128x128xbf16>
    %c0_1 = arith.constant 0 : index
    %c0_2 = arith.constant 0 : index
    %1 = vector.load %arg2[%c0_1, %c0_2] : memref<128x128xbf16, #tpu.memory_space<vmem>>, vector<128x128xbf16>
    %cst = arith.constant dense<0.000000e+00> : vector<128x128xf32>
    %2 = tpu.matmul %0, %1, %cst {dimension_numbers = #tpu.dot_dimension_numbers<[1], [0], [0], [1], [0, 0, 1, 1], [], []>} : vector<128x128xbf16>, vector<128x128xbf16>, vector<128x128xf32> -> vector<128x128xf32>
    %c0_3 = arith.constant 0 : index
    %c0_4 = arith.constant 0 : index
    %3 = vector.load %arg3[%c0_3, %c0_4] : memref<1x128xf32, #tpu.memory_space<vmem>>, vector<1x128xf32>
    %4 = vector.broadcast %3 : vector<1x128xf32> to vector<128x128xf32>
    %5 = arith.addf %2, %4 : vector<128x128xf32>
    %cst_5 = arith.constant 0.000000e+00 : f32
    %6 = vector.broadcast %cst_5 : f32 to vector<128x128xf32>
    %7 = arith.maximumf %5, %6 : vector<128x128xf32>
    %8 = arith.truncf %7 : vector<128x128xf32> to vector<128x128xbf16>
    %c0_6 = arith.constant 0 : index
    %c0_7 = arith.constant 0 : index
    %9 = vector.load %arg4[%c0_6, %c0_7] : memref<128x128xbf16, #tpu.memory_space<vmem>>, vector<128x128xbf16>
    %cst_8 = arith.constant dense<0.000000e+00> : vector<128x128xf32>
    %10 = tpu.matmul %8, %9, %cst_8 {dimension_numbers = #tpu.dot_dimension_numbers<[1], [0], [0], [1], [0, 0, 1, 1], [], []>} : vector<128x128xbf16>, vector<128x128xbf16>, vector<128x128xf32> -> vector<128x128xf32>
    %11 = arith.truncf %10 : vector<128x128xf32> to vector<128x128xbf16>
    %c0_9 = arith.constant 0 : index
    %c0_10 = arith.constant 0 : index
    %12 = vector.load %arg5[%c0_9, %c0_10] : memref<128x128xbf16, #tpu.memory_space<vmem>>, vector<128x128xbf16>
    tpu.vector_store %arg5[%c0_9, %c0_10], %11 {strides = array<i32>} : memref<128x128xbf16, #tpu.memory_space<vmem>>, vector<128x128xbf16>,
    return
  }
  func.func @transform_0(%arg0: i32) -> (i32, i32) {
    %c0_i32 = arith.constant 0 : i32
    %c0_i32_0 = arith.constant 0 : i32
    return %arg0, %c0_i32 : i32, i32
  }
  func.func @transform_1(%arg0: i32) -> (i32, i32) {
    %c0_i32 = arith.constant 0 : i32
    %c0_i32_0 = arith.constant 0 : i32
    %c0_i32_1 = arith.constant 0 : i32
    return %c0_i32, %c0_i32_0 : i32, i32
  }
  func.func @transform_2(%arg0: i32) -> (i32, i32) {
    %c0_i32 = arith.constant 0 : i32
    %c0_i32_0 = arith.constant 0 : i32
    %c0_i32_1 = arith.constant 0 : i32
    return %c0_i32, %c0_i32_0 : i32, i32
  }
  func.func @transform_3(%arg0: i32) -> (i32, i32) {
    %c0_i32 = arith.constant 0 : i32
    %c0_i32_0 = arith.constant 0 : i32
    %c0_i32_1 = arith.constant 0 : i32
    return %c0_i32, %c0_i32_0 : i32, i32
  }
  func.func @transform_4(%arg0: i32) -> (i32, i32) {
    %c0_i32 = arith.constant 0 : i32
    %c0_i32_0 = arith.constant 0 : i32
    return %arg0, %c0_i32 : i32, i32
  }
}

</mosaic_0001>

<bundles_post_ra>
// kernel: tpu_custom_call.1
= control target key start
LH: loop header
LB: loop body
LE: loop exit
PB: predicated region body
PF: predicated region fallthrough
CT: control target
= control target key end

     0   :  { %9 = vsyncpa [#allocation3], 0  ;;  %s785_s0 = inlined_call_operand.hbm [shape: bf16[128,128], index: 0, kind: input, shape index: {}]   ;;  %s786_s1 = inlined_call_operand.hbm [shape: bf16[128,128], index: 1, kind: input, shape index: {}]   ;;  %s787_s2 = inlined_call_operand.vmem [shape: f32[1,128], index: 2, kind: input, shape index: {}]   ;;  %s788_s3 = inlined_call_operand.hbm [shape: bf16[128,128], index: 3, kind: input, shape index: {}]   ;;  %s789_s4 = inlined_call_operand.hbm [shape: bf16[128,128], index: 4, kind: output, shape index: {}]  }
   0x1   :  { %10 = vsyncpa [#allocation6], 0 }
   0x2   :  { %11 = vsyncpa [#allocation4], 0  ;;  %s29_s17 = sshll.u32 %s786_s1, 4  ;;  %s727_s18 = smov [#allocation5]   ;;  %s30_s17 = int_to_ptr.hbm [resolvable:$true] %s29_s17 }
   0x3   :  { %s31_s19 = sshll.u32 %s727_s18, 4  ;;  %s16_s22 = sshll.u32 %s785_s0, 4  ;;  %s32_s19 = int_to_ptr.vmem [resolvable:$true] %s31_s19  ;;  %s17_s22 = int_to_ptr.hbm [resolvable:$true] %s16_s22 }
   0x4   :  { %s728_s23 = smov 64   ;;  %s729_s24 = smov 4  }
   0x5   :  { %37 = dma.hbm_to_vmem [thread:$0]  %s30_s17, 1024, %s32_s19, [#allocation6], %s728_s23, %s728_s23, %s729_s24  }
   0x6   :  { %s730_s25 = smov [#allocation2]   ;;  %s44_s1 = sshll.u32 %s788_s3, 4  ;;  %s45_s1 = int_to_ptr.hbm [resolvable:$true] %s44_s1 }
   0x7   :  { %s18_s26 = sshll.u32 %s730_s25, 4  ;;  %s731_s0 = smov [#allocation7]   ;;  %s19_s26 = int_to_ptr.vmem [resolvable:$true] %s18_s26 }
   0x8   :  { %24 = dma.hbm_to_vmem [thread:$0]  %s17_s22, 1024, %s19_s26, [#allocation3], %s728_s23, %s728_s23, %s729_s24  }
   0x9   :  { %s46_s29 = sshll.u32 %s731_s0, 4  ;;  %s47_s29 = int_to_ptr.vmem [resolvable:$true] %s46_s29 }
   0xa   :  { %52 = dma.hbm_to_vmem [thread:$0]  %s45_s1, 1024, %s47_s29, [#allocation6], %s728_s23, %s728_s23, %s729_s24  }
   0xb   :  { %721 = dma.done.wait [#allocation3], 1024  }
   0xc   :  { %722 = vsyncadd [#allocation3], 4294966272 }
   0xd   :  { %723 = dma.done.wait [#allocation6], 2048  }
   0xe   :  { %724 = vsyncadd [#allocation6], 4294965248  ;;  %v546_v0 = vld [vmem:[#allocation5 + $0x38] sm:$0xff]  ;;  %v545_v1 = vld [vmem:[#allocation5 + $0x30] sm:$0xff]  ;;  %s421_s8 = sshll.u32 %s789_s4, 4  ;;  %s422_s8 = int_to_ptr.hbm [resolvable:$true] %s421_s8 }
   0xf   :  { %197 = vmatpush.bf16.msra.mxu0 %v546_v0  ;;  %602 = vmatpush.bf16.msra.mxu2 %v546_v0  ;;  %v544_v2 = vld [vmem:[#allocation5 + $0x28] sm:$0xff]  ;;  %v543_v3 = vld [vmem:[#allocation5 + $0x20] sm:$0xff]  ;;  %v542_v4 = vld [vmem:[#allocation5 + $0x18] sm:$0xff] }
  0x10   :  { %v541_v5 = vld [vmem:[#allocation5 + $0x10] sm:$0xff]  ;;  %v540_v6 = vld [vmem:[#allocation5 + $0x8] sm:$0xff]  ;;  %v539_v7 = vld [vmem:[#allocation5] sm:$0xff] }
  0x11   :  { %v531_v8 = vld [vmem:[#allocation2] sm:$0xff]  ;;  %v532_v10 = vld [vmem:[#allocation2 + $0x8] sm:$0xff]  ;;  %v554_v12 = vld [vmem:[#allocation7 + $0x38] sm:$0xff] }
  0x12   :  { %v535_v9 = vld [vmem:[#allocation2 + $0x20] sm:$0xff]  ;;  %v536_v11 = vld [vmem:[#allocation2 + $0x28] sm:$0xff]  ;;  %334 = vmatpush.bf16.msra.mxu1 %v554_v12  ;;  %v553_v13 = vld [vmem:[#allocation7 + $0x30] sm:$0xff]  ;;  %610 = vmatpush.bf16.msra.mxu3 %v554_v12 }
  0x13   :  { %198 = vmatpush.bf16.msra.mxu0 %v545_v1  ;;  %603 = vmatpush.bf16.msra.mxu2 %v545_v1  ;;  %v552_v14 = vld [vmem:[#allocation7 + $0x28] sm:$0xff]  ;;  %v551_v15 = vld [vmem:[#allocation7 + $0x20] sm:$0xff]  ;;  %v533_v16 = vld [vmem:[#allocation2 + $0x10] sm:$0xff] }
  0x14   :  { %v537_v17 = vld [vmem:[#allocation2 + $0x30] sm:$0xff]  ;;  %v534_v18 = vld [vmem:[#allocation2 + $0x18] sm:$0xff]  ;;  %v548_v22 = vld [vmem:[#allocation7 + $0x8] sm:$0xff] }
  0x15   :  { %v538_v19 = vld [vmem:[#allocation2 + $0x38] sm:$0xff]  ;;  %v549_v21 = vld [vmem:[#allocation7 + $0x10] sm:$0xff]  ;;  %v547_v23 = vld [vmem:[#allocation7] sm:$0xff] }
  0x16   :  { %335 = vmatpush.bf16.msra.mxu1 %v553_v13  ;;  %611 = vmatpush.bf16.msra.mxu3 %v553_v13  ;;  %v550_v20 = vld [vmem:[#allocation7 + $0x18] sm:$0xff]  ;;  %v624_v25 = vld [vmem:[%s787_s2] ss:$0 sm:$0xff]  ;;  %s732_s2 = smov [#allocation8]  }
  0x17   :  { %199 = vmatpush.bf16.msra.mxu0 %v544_v2  ;;  %604 = vmatpush.bf16.msra.mxu2 %v544_v2  ;;  %s419_s5 = sshll.u32 %s732_s2, 4  ;;  %s420_s5 = int_to_ptr.vmem [resolvable:$true] %s419_s5 }
  0x1a   :  { %336 = vmatpush.bf16.msra.mxu1 %v552_v14  ;;  %612 = vmatpush.bf16.msra.mxu3 %v552_v14 }
  0x1b   :  { %200 = vmatpush.bf16.msra.mxu0 %v543_v3  ;;  %605 = vmatpush.bf16.msra.mxu2 %v543_v3 }
  0x1e   :  { %337 = vmatpush.bf16.msra.mxu1 %v551_v15  ;;  %613 = vmatpush.bf16.msra.mxu3 %v551_v15 }
  0x1f   :  { %201 = vmatpush.bf16.msra.mxu0 %v542_v4  ;;  %606 = vmatpush.bf16.msra.mxu2 %v542_v4 }
  0x22   :  { %338 = vmatpush.bf16.msra.mxu1 %v550_v20  ;;  %614 = vmatpush.bf16.msra.mxu3 %v550_v20 }
  0x23   :  { %202 = vmatpush.bf16.msra.mxu0 %v541_v5  ;;  %607 = vmatpush.bf16.msra.mxu2 %v541_v5 }
  0x26   :  { %339 = vmatpush.bf16.msra.mxu1 %v549_v21  ;;  %615 = vmatpush.bf16.msra.mxu3 %v549_v21 }
  0x27   :  { %203 = vmatpush.bf16.msra.mxu0 %v540_v6  ;;  %608 = vmatpush.bf16.msra.mxu2 %v540_v6 }
  0x2a   :  { %340 = vmatpush.bf16.msra.mxu1 %v548_v22  ;;  %616 = vmatpush.bf16.msra.mxu3 %v548_v22 }
  0x2b   :  { %204 = vmatpush.bf16.msra.mxu0 %v539_v7  ;;  %609 = vmatpush.bf16.msra.mxu2 %v539_v7 }
  0x2e   :  { %205 = vmatmul.bf16.vlgmr.msra.gmra.mxu0 %v531_v8  ;;  %225 = vmatmul.bf16.vlgmr.msra.gmra.mxu2 %v535_v9 }
  0x2f   :  { %341 = vmatpush.bf16.msra.mxu1 %v547_v23  ;;  %617 = vmatpush.bf16.msra.mxu3 %v547_v23 }
  0x3e   :  { %210 = vmatmul.bf16.gmra.mxu0 %v532_v10  ;;  %230 = vmatmul.bf16.gmra.mxu2 %v536_v11 }
  0x4e   :  { %215 = vmatmul.bf16.gmra.mxu0 %v533_v16  ;;  %235 = vmatmul.bf16.gmra.mxu2 %v537_v17 }
  0x5e   :  { %220 = vmatmul.bf16.gmra.mxu0 %v534_v18  ;;  %240 = vmatmul.bf16.gmra.mxu2 %v538_v19 }
  0xab   :  { %v206_v24 = vpop.f32.mrf.mxu0 }
  0xac   :  { %v207_v26 = vadd.f32 %v624_v25, %v206_v24 }
  0xae   :  { %v246_v29 = vmax.f32 %v207_v26, 0.0 }
  0xb1   :  { %v226_v27 = vpop.f32.mrf.mxu2 }
  0xb2   :  { %v227_v32 = vadd.f32 %v624_v25, %v226_v27 }
  0xb3   :  { %v208_v28 = vpop.f32.mrf.mxu0 }
  0xb4   :  { %v209_v30 = vadd.f32 %v624_v25, %v208_v28  ;;  %v254_v37 = vmax.f32 %v227_v32, 0.0 }
  0xb6   :  { %v247_v31 = vmax.f32 %v209_v30, 0.0 }
  0xb8   :  { %v262_v33 = vpack.c.bf16 %v247_v31, %v246_v29 }
  0xb9   :  { %v228_v34 = vpop.f32.mrf.mxu2 }
  0xba   :  { %v229_v35 = vadd.f32 %v624_v25, %v228_v34  ;;  %342 = vmatmul.bf16.vlgmr.msra.gmra.mxu1 %v262_v33 }
  0xbb   :  { %v211_v36 = vpop.f32.mrf.mxu0 }
  0xbc   :  { %v255_v38 = vmax.f32 %v229_v35, 0.0  ;;  %v212_v40 = vadd.f32 %v624_v25, %v211_v36 }
  0xbe   :  { %v266_v39 = vpack.c.bf16 %v255_v38, %v254_v37  ;;  %v248_v43 = vmax.f32 %v212_v40, 0.0 }
  0xc0   :  { %362 = vmatmul.bf16.vlgmr.msra.gmra.mxu3 %v266_v39 }
  0xc1   :  { %v231_v41 = vpop.f32.mrf.mxu2 }
  0xc2   :  { %v232_v46 = vadd.f32 %v624_v25, %v231_v41 }
  0xc3   :  { %v213_v42 = vpop.f32.mrf.mxu0 }
  0xc4   :  { %v214_v44 = vadd.f32 %v624_v25, %v213_v42  ;;  %v256_v51 = vmax.f32 %v232_v46, 0.0 }
  0xc6   :  { %v249_v45 = vmax.f32 %v214_v44, 0.0 }
  0xc8   :  { %v263_v47 = vpack.c.bf16 %v249_v45, %v248_v43 }
  0xc9   :  { %v233_v48 = vpop.f32.mrf.mxu2 }
  0xca   :  { %v234_v49 = vadd.f32 %v624_v25, %v233_v48  ;;  %347 = vmatmul.bf16.gmra.mxu1 %v263_v47 }
  0xcb   :  { %v216_v50 = vpop.f32.mrf.mxu0 }
  0xcc   :  { %v257_v52 = vmax.f32 %v234_v49, 0.0  ;;  %v217_v54 = vadd.f32 %v624_v25, %v216_v50 }
  0xce   :  { %v267_v53 = vpack.c.bf16 %v257_v52, %v256_v51  ;;  %v250_v57 = vmax.f32 %v217_v54, 0.0 }
  0xd0   :  { %367 = vmatmul.bf16.gmra.mxu3 %v267_v53 }
  0xd1   :  { %v236_v55 = vpop.f32.mrf.mxu2 }
  0xd2   :  { %v237_v60 = vadd.f32 %v624_v25, %v236_v55 }
  0xd3   :  { %v218_v56 = vpop.f32.mrf.mxu0 }
  0xd4   :  { %v219_v58 = vadd.f32 %v624_v25, %v218_v56  ;;  %v258_v1 = vmax.f32 %v237_v60, 0.0 }
  0xd6   :  { %v251_v59 = vmax.f32 %v219_v58, 0.0 }
  0xd8   :  { %v264_v61 = vpack.c.bf16 %v251_v59, %v250_v57 }
  0xd9   :  { %v238_v62 = vpop.f32.mrf.mxu2 }
  0xda   :  { %v239_v63 = vadd.f32 %v624_v25, %v238_v62  ;;  %352 = vmatmul.bf16.gmra.mxu1 %v264_v61 }
  0xdb   :  { %v221_v0 = vpop.f32.mrf.mxu0 }
  0xdc   :  { %v259_v2 = vmax.f32 %v239_v63, 0.0  ;;  %v222_v4 = vadd.f32 %v624_v25, %v221_v0 }
  0xde   :  { %v268_v3 = vpack.c.bf16 %v259_v2, %v258_v1  ;;  %v252_v7 = vmax.f32 %v222_v4, 0.0 }
  0xe0   :  { %372 = vmatmul.bf16.gmra.mxu3 %v268_v3 }
  0xe1   :  { %v241_v5 = vpop.f32.mrf.mxu2 }
  0xe2   :  { %v242_v10 = vadd.f32 %v624_v25, %v241_v5 }
  0xe3   :  { %v223_v6 = vpop.f32.mrf.mxu0 }
  0xe4   :  { %v224_v8 = vadd.f32 %v624_v25, %v223_v6  ;;  %v260_v14 = vmax.f32 %v242_v10, 0.0 }
  0xe6   :  { %v253_v9 = vmax.f32 %v224_v8, 0.0 }
  0xe8   :  { %v265_v11 = vpack.c.bf16 %v253_v9, %v252_v7 }
  0xe9   :  { %v243_v12 = vpop.f32.mrf.mxu2 }
  0xea   :  { %v244_v13 = vadd.f32 %v624_v25, %v243_v12  ;;  %357 = vmatmul.bf16.gmra.mxu1 %v265_v11 }
  0xec   :  { %v261_v15 = vmax.f32 %v244_v13, 0.0 }
  0xee   :  { %v269_v16 = vpack.c.bf16 %v261_v15, %v260_v14 }
  0xf0   :  { %377 = vmatmul.bf16.gmra.mxu3 %v269_v16 }
 0x137   :  { %v343_v17 = vpop.f32.mrf.mxu1 }
 0x13f   :  { %v345_v18 = vpop.f32.mrf.mxu1 }
 0x140   :  { %v558_v19 = vpack.c.bf16 %v345_v18, %v343_v17 }
 0x142   :  { %559 = vst [vmem:[#allocation8] sm:$0xff] %v558_v19  }
 0x143   :  { %v363_v20 = vpop.f32.mrf.mxu3 }
 0x147   :  { %v348_v21 = vpop.f32.mrf.mxu1 }
 0x14b   :  { %v365_v22 = vpop.f32.mrf.mxu3 }
 0x14c   :  { %v578_v23 = vpack.c.bf16 %v365_v22, %v363_v20 }
 0x14e   :  { %598 = vst [vmem:[#allocation8 + $0x20] sm:$0xff] %v578_v23  }
 0x14f   :  { %v350_v24 = vpop.f32.mrf.mxu1 }
 0x150   :  { %v563_v26 = vpack.c.bf16 %v350_v24, %v348_v21 }
 0x152   :  { %595 = vst [vmem:[#allocation8 + $0x8] sm:$0xff] %v563_v26  }
 0x153   :  { %v368_v27 = vpop.f32.mrf.mxu3 }
 0x157   :  { %v353_v28 = vpop.f32.mrf.mxu1 }
 0x15b   :  { %v370_v25 = vpop.f32.mrf.mxu3 }
 0x15c   :  { %v583_v29 = vpack.c.bf16 %v370_v25, %v368_v27 }
 0x15e   :  { %599 = vst [vmem:[#allocation8 + $0x28] sm:$0xff] %v583_v29  }
 0x15f   :  { %v355_v30 = vpop.f32.mrf.mxu1 }
 0x160   :  { %v568_v31 = vpack.c.bf16 %v355_v30, %v353_v28 }
 0x162   :  { %596 = vst [vmem:[#allocation8 + $0x10] sm:$0xff] %v568_v31  }
 0x163   :  { %v373_v32 = vpop.f32.mrf.mxu3 }
 0x167   :  { %v358_v33 = vpop.f32.mrf.mxu1 }
 0x16b   :  { %v375_v34 = vpop.f32.mrf.mxu3 }
 0x16c   :  { %v588_v35 = vpack.c.bf16 %v375_v34, %v373_v32 }
 0x16e   :  { %600 = vst [vmem:[#allocation8 + $0x30] sm:$0xff] %v588_v35  }
 0x16f   :  { %v360_v36 = vpop.f32.mrf.mxu1 }
 0x170   :  { %v573_v37 = vpack.c.bf16 %v360_v36, %v358_v33 }
 0x172   :  { %597 = vst [vmem:[#allocation8 + $0x18] sm:$0xff] %v573_v37  }
 0x173   :  { %v378_v38 = vpop.f32.mrf.mxu3 }
 0x17b   :  { %v380_v39 = vpop.f32.mrf.mxu3 }
 0x17c   :  { %v593_v40 = vpack.c.bf16 %v380_v39, %v378_v38 }
 0x17e   :  { %601 = vst [vmem:[#allocation8 + $0x38] sm:$0xff] %v593_v40  }
 0x17f   :  { %427 = dma.vmem_to_hbm [thread:$0]  %s420_s5, 1024, %s422_s8, [#allocation4], %s728_s23, %s728_s23, %s729_s24  }
 0x180   :  { %725 = dma.done.wait [#allocation4], 1024  }
 0x181   :  { %726 = vsyncadd [#allocation4], 4294966272 }
 0x182   :  { %432 = vsyncpa [#allocation3], 1 }
 0x183   :  { %433 = vsyncpa [#allocation6], 1 }
 0x184   :  { %434 = vsyncpa [#allocation4], 1 }

</bundles_post_ra>
